<compile_context>
chip_gen: v6e
topology: v6e:2x2x1
jax: 0.10.0
libtpu: 0.0.40
codegen_flags: <defaults>
</compile_context>

<pallas_src>
import functools

import jax
import jax.numpy as jnp
from jax.experimental import pallas as pl
from jax.experimental.pallas import tpu as pltpu

SELU_ALPHA = 1.6732632423543772848170429916717
SELU_SCALE = 1.0507009873554804934193349852946
BN_EPS = 1e-5

# Max pooled-output columns handled by one small pooling-matmul tile (keeps the
# pooling matrix at most (128*P, 128) f32 regardless of sequence length).
_POOL_TILE = 128


def _fused_kernel(pad, ksize, nb, lout, lpool, psize,
                  x_ref, w_ref, b_ref, pm_ref,
                  pooled_ref, sum_ref, m2_ref,
                  xpad_ref):
    """Fused Conv1d + SELU + BN partial stats + AvgPool1d for NB batch elements.

    x_ref     : (NB, Cin, L)        raw input block (PyTorch NCL, unpadded)
    w_ref     : (Cout, K*Cin)       conv weight, taps folded into the contraction
    b_ref     : (Cout, 1)           conv bias
    pm_ref    : (TJ*P, TJ)          small tiled average-pooling matrix (1/P folded in)
    pooled_ref: (NB, Cout, Lpool)   pooled, un-normalized SELU(conv(x))
    sum_ref   : (1, Cout, 1)        per-step per-channel sum of SELU(conv(x))
    m2_ref    : (1, Cout, 1)        per-step per-channel centered sum of squares
    xpad_ref  : (NB, Cin, L+2*pad)  VMEM scratch for in-kernel zero padding
    """
    _, cin, L = x_ref.shape

    # In-VMEM zero padding (no wrapper-side jnp.pad HBM pass).  Pad columns are
    # re-zeroed every step on purpose: the scratch is per-core and under megacore
    # "parallel" partitioning a core may never run program_id 0.
    if pad > 0:
        xpad_ref[:, :, :pad] = jnp.zeros((nb, cin, pad), jnp.float32)
        xpad_ref[:, :, pad + L:] = jnp.zeros((nb, cin, pad), jnp.float32)
    xpad_ref[:, :, pad:pad + L] = x_ref[...]

    # im2col: fold the K taps into the contraction and lay the NB elements'
    # Lout windows out contiguously along the lane axis -> (K*Cin, NB*Lout).
    cols = []
    for n in range(nb):
        xp = xpad_ref[n]                                           # (Cin, Lp)
        cols.append(jnp.concatenate(
            [xp[:, t:t + lout] for t in range(ksize)], axis=0))    # (K*Cin, Lout)
    xstack = cols[0] if nb == 1 else jnp.concatenate(cols, axis=1)

    # Conv1d (stride=1) for all NB elements as ONE MXU matmul; bias added once.
    acc = jax.lax.dot_general(
        w_ref[...], xstack,
        dimension_numbers=(((1,), (0,)), ((), ())),
        preferred_element_type=jnp.float32)                        # (Cout, NB*Lout)
    acc = acc + b_ref[...]

    # SELU.  Negative branch: exp(x) - 1 on the pre-clamped argument -> a single
    # EUP op per element (the EUP has one VLIW slot and is the hot path here).
    y = SELU_SCALE * jnp.where(
        acc > 0, acc, SELU_ALPHA * (jnp.exp(jnp.minimum(acc, 0.0)) - 1.0))

    # BatchNorm1d partial statistics over this step's NB*Lout samples per channel:
    # channel sum and centered sum of squares, merged across steps in the wrapper.
    inv_cnt = 1.0 / float(nb * lout)
    s1 = jnp.sum(y, axis=1, keepdims=True)                         # (Cout, 1)
    d = y - s1 * inv_cnt
    m2 = jnp.sum(d * d, axis=1, keepdims=True)                     # (Cout, 1)
    sum_ref[0] = s1
    m2_ref[0] = m2

    # AvgPool1d(kernel=P, stride=P) per element, as matmuls against a SMALL tiled
    # pooling matrix (flops O(L), VMEM O(1)).  Trailing Lout % P columns are dropped
    # (PyTorch truncation) simply by never reading them.
    tj_full = pm_ref.shape[1]
    for n in range(nb):
        base = n * lout
        for j0 in range(0, lpool, tj_full):
            tj = min(tj_full, lpool - j0)
            seg = y[:, base + j0 * psize: base + (j0 + tj) * psize]  # (Cout, tj*P)
            pooled_ref[n, :, j0:j0 + tj] = jax.lax.dot_general(
                seg, pm_ref[:tj * psize, :tj],
                dimension_numbers=(((1,), (0,)), ((), ())),
                preferred_element_type=jnp.float32)                 # (Cout, tj)


def _pick_batch_block(n, per_elem_bytes, budget_bytes):
    """Largest divisor of n whose per-step working set fits the budget, while
    keeping at least two grid steps so megacore chips can split the batch axis."""
    cap = max(1, budget_bytes // max(per_elem_bytes, 1))
    if n >= 2:
        cap = min(cap, n // 2)
    nb = 1
    for d in range(1, n + 1):
        if n % d == 0 and d <= cap:
            nb = d
    return nb


def feature_extractor_block(x, weight, bias, gamma, beta, *, pool_size):
    """x: (N, Cin, L); weight: (Cout, Cin, K); bias/gamma/beta: (Cout,).

    Returns (N, Cout, Lpool) in PyTorch NCL layout (no post-kernel transpose)."""
    N, Cin, L = x.shape
    Cout, _, K = weight.shape
    pad = K // 2
    Lp = L + 2 * pad
    Lout = Lp - K + 1
    P = pool_size
    Lpool = Lout // P

    x = x.astype(jnp.float32)
    # Conv weight, tap-major flatten: w2[o, t*Cin + c] = weight[o, c, t].
    w2 = jnp.transpose(weight, (0, 2, 1)).reshape(Cout, K * Cin).astype(jnp.float32)
    b2 = bias.reshape(Cout, 1).astype(jnp.float32)

    # Small tiled pooling matrix (TJ*P, TJ), 1/P folded in.
    TJ = max(1, min(Lpool, _POOL_TILE))
    pm = (jnp.arange(TJ * P)[:, None] // P ==
          jnp.arange(TJ)[None, :]).astype(jnp.float32) / jnp.float32(P)

    # Batch elements per grid step from a per-step VMEM budget (~12 MiB working set).
    per_elem = 4 * (2 * Cin * L                       # double-buffered input block
                    + Cin * Lp                        # pad scratch
                    + (K * Cin + 4 * Cout) * Lout     # im2col + conv/SELU temporaries
                    + 2 * Cout * Lpool)               # double-buffered pooled block
    NB = _pick_batch_block(N, per_elem, 12 << 20)
    G = N // NB

    const_bytes = 4 * (Cout * K * Cin + Cout + TJ * P * TJ)
    per_step = NB * per_elem + 2 * const_bytes + 4 * 4 * Cout
    vmem_limit = int(min(max(2 * per_step, 4 << 20), 32 << 20))

    flops = 2 * N * Lout * (K * Cin) * Cout + 2 * N * Cout * Lpool * (TJ * P)
    bytes_accessed = 4 * (N * Cin * L + N * Cout * Lpool + 2 * G * Cout
                          + Cout * (K * Cin + 1) + TJ * P * TJ)
    cost = pl.CostEstimate(flops=int(flops),
                           transcendentals=int(N * Cout * Lout),
                           bytes_accessed=int(bytes_accessed))

    pooled, ssum, sm2 = pl.pallas_call(
        functools.partial(_fused_kernel, pad, K, NB, Lout, Lpool, P),
        grid=(G,),
        in_specs=[
            pl.BlockSpec((NB, Cin, L), lambda g: (g, 0, 0)),        # per-step input
            pl.BlockSpec((Cout, K * Cin), lambda g: (0, 0)),        # resident weight
            pl.BlockSpec((Cout, 1), lambda g: (0, 0)),              # resident bias
            pl.BlockSpec((TJ * P, TJ), lambda g: (0, 0)),           # resident pool tile
        ],
        out_specs=[
            pl.BlockSpec((NB, Cout, Lpool), lambda g: (g, 0, 0)),   # pooled (NCL)
            pl.BlockSpec((1, Cout, 1), lambda g: (g, 0, 0)),        # per-step BN sum
            pl.BlockSpec((1, Cout, 1), lambda g: (g, 0, 0)),        # per-step BN M2
        ],
        out_shape=[
            jax.ShapeDtypeStruct((N, Cout, Lpool), jnp.float32),
            jax.ShapeDtypeStruct((G, Cout, 1), jnp.float32),
            jax.ShapeDtypeStruct((G, Cout, 1), jnp.float32),
        ],
        scratch_shapes=[pltpu.VMEM((NB, Cin, Lp), jnp.float32)],
        compiler_params=pltpu.CompilerParams(
            dimension_semantics=("parallel",),
            vmem_limit_bytes=vmem_limit),
        cost_estimate=cost,
    )(x, w2, b2, pm)

    # Merge per-step BN stats (parallel-variance combination; biased variance,
    # training-mode BatchNorm1d semantics).
    sums = ssum[:, :, 0]                                    # (G, Cout)
    m2s = sm2[:, :, 0]                                      # (G, Cout)
    cblk = jnp.float32(NB * Lout)
    total = jnp.float32(N * Lout)
    mean_blk = sums / cblk
    mean = jnp.sum(sums, axis=0) / total                    # (Cout,)
    var = (jnp.sum(m2s, axis=0)
           + cblk * jnp.sum((mean_blk - mean[None, :]) ** 2, axis=0)) / total
    inv_std = jax.lax.rsqrt(var + BN_EPS)
    g32 = gamma.astype(jnp.float32)
    scale = g32 * inv_std
    shift = beta.astype(jnp.float32) - mean * scale

    # BN normalize + affine applied AFTER pooling (per-channel affine commutes with
    # average pooling); plain XLA elementwise so it fuses with downstream consumers.
    return pooled * scale[None, :, None] + shift[None, :, None]


def _reference(x_ncl, weight, bias, gamma, beta, *, pool_size):
    """Pure-JAX reference with identical math (for verification)."""
    N, Cin, L = x_ncl.shape
    Cout, _, K = weight.shape
    pad = K // 2
    Lout = L + 2 * pad - K + 1
    xpad = jnp.pad(x_ncl, ((0, 0), (0, 0), (pad, pad)))
    xpad = jnp.transpose(xpad, (0, 2, 1))
    acc = jnp.zeros((N, Lout, Cout), jnp.float32) + bias[None, None, :]
    for t in range(K):
        acc = acc + jnp.einsum("nlc,co->nlo", xpad[:, t:t + Lout, :],
                               weight[:, :, t].T)
    y = SELU_SCALE * jnp.where(acc > 0, acc, SELU_ALPHA * jnp.expm1(acc))
    mean = jnp.mean(y, axis=(0, 1), keepdims=True)
    var = jnp.mean((y - mean) ** 2, axis=(0, 1), keepdims=True)    # biased
    yn = (y - mean) / jnp.sqrt(var + BN_EPS)
    yn = yn * gamma[None, None, :] + beta[None, None, :]
    Lpool = Lout // pool_size
    yp = yn[:, :Lpool * pool_size, :].reshape(N, Lpool, pool_size, Cout)
    return jnp.transpose(jnp.mean(yp, axis=2), (0, 2, 1))


if __name__ == "__main__":
    # Small Conv1d-consistent shapes: batch=2, in_channels=4, out_channels=8,
    # length=16, kernel_size=3, pool_size=2.
    N, Cin, Cout, L, K, P = 2, 4, 8, 16, 3, 2

    key = jax.random.PRNGKey(0)
    kx, kw, kb, kg, kbe = jax.random.split(key, 5)

    x = jax.random.normal(kx, (N, Cin, L), dtype=jnp.float32)

    # Deterministic parameter init (PyTorch-like uniform bound for conv).
    bound = 1.0 / jnp.sqrt(jnp.float32(Cin * K))
    weight = jax.random.uniform(kw, (Cout, Cin, K), jnp.float32, -bound, bound)
    bias = jax.random.uniform(kb, (Cout,), jnp.float32, -bound, bound)
    gamma = 1.0 + 0.1 * jax.random.normal(kg, (Cout,), jnp.float32)
    beta = 0.1 * jax.random.normal(kbe, (Cout,), jnp.float32)

    fn = jax.jit(functools.partial(feature_extractor_block, pool_size=P))
    out = jax.block_until_ready(fn(x, weight, bias, gamma, beta))

    ref = _reference(x, weight, bias, gamma, beta, pool_size=P)
    assert out.shape == (N, Cout, L // P), out.shape
    assert jnp.allclose(out, ref, rtol=1e-4, atol=1e-4), "mismatch vs reference"

    print("KERNEL_OK")
</pallas_src>

<mosaic_0001>
module attributes {stable_mosaic.version = 11 : i64} {
  func.func @_fused_kernel(%arg0: i32, %arg1: memref<1x4x16xf32, #tpu.memory_space<vmem>>, %arg2: memref<8x12xf32, #tpu.memory_space<vmem>>, %arg3: memref<8x1xf32, #tpu.memory_space<vmem>>, %arg4: memref<16x8xf32, #tpu.memory_space<vmem>>, %arg5: memref<1x8x8xf32, #tpu.memory_space<vmem>>, %arg6: memref<1x8x1xf32, #tpu.memory_space<vmem>>, %arg7: memref<1x8x1xf32, #tpu.memory_space<vmem>>, %arg8: memref<1x4x18xf32, #tpu.memory_space<vmem>>) attributes {dimension_semantics = [#tpu.dimension_semantics<parallel>], iteration_bounds = array<i64: 2>, scalar_prefetch = 0 : i64, scratch_operands = 1 : i64, tpu.core_type = #tpu.core_type<tc>, window_params = [{transform_indices = @transform_0, window_bounds = array<i64: 1, 4, 16>}, {pipeline_mode = #tpu.pipeline_mode<synchronous>, transform_indices = @transform_1, window_bounds = array<i64: 8, 12>}, {pipeline_mode = #tpu.pipeline_mode<synchronous>, transform_indices = @transform_2, window_bounds = array<i64: 8, 1>}, {pipeline_mode = #tpu.pipeline_mode<synchronous>, transform_indices = @transform_3, window_bounds = array<i64: 16, 8>}, {transform_indices = @transform_4, window_bounds = array<i64: 1, 8, 8>}, {transform_indices = @transform_5, window_bounds = array<i64: 1, 8, 1>}, {transform_indices = @transform_6, window_bounds = array<i64: 1, 8, 1>}]} {
    %cst = arith.constant 0.000000e+00 : f32
    %0 = vector.broadcast %cst : f32 to vector<1x4x1xf32>
    %c0 = arith.constant 0 : index
    %c0_0 = arith.constant 0 : index
    %c0_1 = arith.constant 0 : index
    %1 = vector.load %arg8[%c0, %c0_0, %c0_1] : memref<1x4x18xf32, #tpu.memory_space<vmem>>, vector<1x4x1xf32>
    tpu.vector_store %arg8[%c0, %c0_0, %c0_1], %0 {strides = array<i32>} : memref<1x4x18xf32, #tpu.memory_space<vmem>>, vector<1x4x1xf32>,
    %cst_2 = arith.constant 0.000000e+00 : f32
    %2 = vector.broadcast %cst_2 : f32 to vector<1x4x1xf32>
    %c0_3 = arith.constant 0 : index
    %c0_4 = arith.constant 0 : index
    %c17 = arith.constant 17 : index
    %3 = vector.load %arg8[%c0_3, %c0_4, %c17] : memref<1x4x18xf32, #tpu.memory_space<vmem>>, vector<1x4x1xf32>
    tpu.vector_store %arg8[%c0_3, %c0_4, %c17], %2 {strides = array<i32>} : memref<1x4x18xf32, #tpu.memory_space<vmem>>, vector<1x4x1xf32>,
    %c0_5 = arith.constant 0 : index
    %c0_6 = arith.constant 0 : index
    %c0_7 = arith.constant 0 : index
    %4 = vector.load %arg1[%c0_5, %c0_6, %c0_7] : memref<1x4x16xf32, #tpu.memory_space<vmem>>, vector<1x4x16xf32>
    %c0_8 = arith.constant 0 : index
    %c0_9 = arith.constant 0 : index
    %c1 = arith.constant 1 : index
    %5 = vector.load %arg8[%c0_8, %c0_9, %c1] : memref<1x4x18xf32, #tpu.memory_space<vmem>>, vector<1x4x16xf32>
    tpu.vector_store %arg8[%c0_8, %c0_9, %c1], %4 {strides = array<i32>} : memref<1x4x18xf32, #tpu.memory_space<vmem>>, vector<1x4x16xf32>,
    %c0_10 = arith.constant 0 : index
    %c0_11 = arith.constant 0 : index
    %c0_12 = arith.constant 0 : index
    %6 = vector.load %arg8[%c0_10, %c0_11, %c0_12] : memref<1x4x18xf32, #tpu.memory_space<vmem>>, vector<1x4x18xf32>
    %7 = vector.shape_cast %6 : vector<1x4x18xf32> to vector<4x18xf32>
    %8 = vector.extract_strided_slice %7 {offsets = [0, 0], sizes = [4, 16], strides = [1, 1]} : vector<4x18xf32> to vector<4x16xf32>
    %9 = vector.extract_strided_slice %7 {offsets = [0, 1], sizes = [4, 16], strides = [1, 1]} : vector<4x18xf32> to vector<4x16xf32>
    %10 = vector.extract_strided_slice %7 {offsets = [0, 2], sizes = [4, 16], strides = [1, 1]} : vector<4x18xf32> to vector<4x16xf32>
    %11 = tpu.concatenate %8, %9, %10 in 0 : vector<4x16xf32>, vector<4x16xf32>, vector<4x16xf32> -> vector<12x16xf32>
    %c0_13 = arith.constant 0 : index
    %c0_14 = arith.constant 0 : index
    %12 = vector.load %arg2[%c0_13, %c0_14] : memref<8x12xf32, #tpu.memory_space<vmem>>, vector<8x12xf32>
    %cst_15 = arith.constant dense<0.000000e+00> : vector<8x16xf32>
    %13 = tpu.matmul %12, %11, %cst_15 {dimension_numbers = #tpu.dot_dimension_numbers<[1], [0], [0], [1], [0, 0, 1, 1], [], []>} : vector<8x12xf32>, vector<12x16xf32>, vector<8x16xf32> -> vector<8x16xf32>
    %c0_16 = arith.constant 0 : index
    %c0_17 = arith.constant 0 : index
    %14 = vector.load %arg3[%c0_16, %c0_17] : memref<8x1xf32, #tpu.memory_space<vmem>>, vector<8x1xf32>
    %15 = vector.broadcast %14 : vector<8x1xf32> to vector<8x16xf32>
    %16 = arith.addf %13, %15 : vector<8x16xf32>
    %cst_18 = arith.constant 0.000000e+00 : f32
    %17 = vector.broadcast %cst_18 : f32 to vector<8x16xf32>
    %18 = arith.cmpf ogt, %16, %17 : vector<8x16xf32>
    %cst_19 = arith.constant 0.000000e+00 : f32
    %19 = vector.broadcast %cst_19 : f32 to vector<8x16xf32>
    %20 = arith.minimumf %16, %19 : vector<8x16xf32>
    %21 = math.exp %20 : vector<8x16xf32>
    %cst_20 = arith.constant 1.000000e+00 : f32
    %22 = vector.broadcast %cst_20 : f32 to vector<8x16xf32>
    %23 = arith.subf %21, %22 : vector<8x16xf32>
    %cst_21 = arith.constant 1.67326319 : f32
    %24 = vector.broadcast %cst_21 : f32 to vector<8x16xf32>
    %25 = arith.mulf %24, %23 : vector<8x16xf32>
    %26 = arith.select %18, %16, %25 : vector<8x16xi1>, vector<8x16xf32>
    %cst_22 = arith.constant 1.05070102 : f32
    %27 = vector.broadcast %cst_22 : f32 to vector<8x16xf32>
    %28 = arith.mulf %27, %26 : vector<8x16xf32>
    %cst_23 = arith.constant dense<0.000000e+00> : vector<8xf32>
    %29 = vector.multi_reduction <add>, %28, %cst_23 [1] : vector<8x16xf32> to vector<8xf32>
    %30 = vector.shape_cast %29 : vector<8xf32> to vector<8x1xf32>
    %cst_24 = arith.constant 6.250000e-02 : f32
    %31 = vector.broadcast %cst_24 : f32 to vector<8x1xf32>
    %32 = arith.mulf %30, %31 : vector<8x1xf32>
    %33 = vector.broadcast %32 : vector<8x1xf32> to vector<8x16xf32>
    %34 = arith.subf %28, %33 : vector<8x16xf32>
    %35 = arith.mulf %34, %34 : vector<8x16xf32>
    %cst_25 = arith.constant dense<0.000000e+00> : vector<8xf32>
    %36 = vector.multi_reduction <add>, %35, %cst_25 [1] : vector<8x16xf32> to vector<8xf32>
    %37 = vector.shape_cast %36 : vector<8xf32> to vector<8x1xf32>
    %c0_26 = arith.constant 0 : index
    %c0_27 = arith.constant 0 : index
    %c0_28 = arith.constant 0 : index
    %38 = vector.load %arg6[%c0_26, %c0_27, %c0_28] : memref<1x8x1xf32, #tpu.memory_space<vmem>>, vector<1x8x1xf32>
    %39 = vector.shape_cast %38 : vector<1x8x1xf32> to vector<8x1xf32>
    %40 = vector.shape_cast %30 : vector<8x1xf32> to vector<1x8x1xf32>
    tpu.vector_store %arg6[%c0_26, %c0_27, %c0_28], %40 {strides = array<i32>} : memref<1x8x1xf32, #tpu.memory_space<vmem>>, vector<1x8x1xf32>,
    %c0_29 = arith.constant 0 : index
    %c0_30 = arith.constant 0 : index
    %c0_31 = arith.constant 0 : index
    %41 = vector.load %arg7[%c0_29, %c0_30, %c0_31] : memref<1x8x1xf32, #tpu.memory_space<vmem>>, vector<1x8x1xf32>
    %42 = vector.shape_cast %41 : vector<1x8x1xf32> to vector<8x1xf32>
    %43 = vector.shape_cast %37 : vector<8x1xf32> to vector<1x8x1xf32>
    tpu.vector_store %arg7[%c0_29, %c0_30, %c0_31], %43 {strides = array<i32>} : memref<1x8x1xf32, #tpu.memory_space<vmem>>, vector<1x8x1xf32>,
    %c0_32 = arith.constant 0 : index
    %c0_33 = arith.constant 0 : index
    %44 = vector.load %arg4[%c0_32, %c0_33] : memref<16x8xf32, #tpu.memory_space<vmem>>, vector<16x8xf32>
    %cst_34 = arith.constant dense<0.000000e+00> : vector<8x8xf32>
    %45 = tpu.matmul %28, %44, %cst_34 {dimension_numbers = #tpu.dot_dimension_numbers<[1], [0], [0], [1], [0, 0, 1, 1], [], []>} : vector<8x16xf32>, vector<16x8xf32>, vector<8x8xf32> -> vector<8x8xf32>
    %c0_35 = arith.constant 0 : index
    %c0_36 = arith.constant 0 : index
    %c0_37 = arith.constant 0 : index
    %46 = vector.load %arg5[%c0_35, %c0_36, %c0_37] : memref<1x8x8xf32, #tpu.memory_space<vmem>>, vector<1x8x8xf32>
    %47 = vector.shape_cast %46 : vector<1x8x8xf32> to vector<8x8xf32>
    %48 = vector.shape_cast %45 : vector<8x8xf32> to vector<1x8x8xf32>
    tpu.vector_store %arg5[%c0_35, %c0_36, %c0_37], %48 {strides = array<i32>} : memref<1x8x8xf32, #tpu.memory_space<vmem>>, vector<1x8x8xf32>,
    return
  }
  func.func @transform_0(%arg0: i32) -> (i32, i32, i32) {
    %c0_i32 = arith.constant 0 : i32
    %c0_i32_0 = arith.constant 0 : i32
    %c0_i32_1 = arith.constant 0 : i32
    return %arg0, %c0_i32, %c0_i32_0 : i32, i32, i32
  }
  func.func @transform_1(%arg0: i32) -> (i32, i32) {
    %c0_i32 = arith.constant 0 : i32
    %c0_i32_0 = arith.constant 0 : i32
    %c0_i32_1 = arith.constant 0 : i32
    return %c0_i32, %c0_i32_0 : i32, i32
  }
  func.func @transform_2(%arg0: i32) -> (i32, i32) {
    %c0_i32 = arith.constant 0 : i32
    %c0_i32_0 = arith.constant 0 : i32
    %c0_i32_1 = arith.constant 0 : i32
    return %c0_i32, %c0_i32_0 : i32, i32
  }
  func.func @transform_3(%arg0: i32) -> (i32, i32) {
    %c0_i32 = arith.constant 0 : i32
    %c0_i32_0 = arith.constant 0 : i32
    %c0_i32_1 = arith.constant 0 : i32
    return %c0_i32, %c0_i32_0 : i32, i32
  }
  func.func @transform_4(%arg0: i32) -> (i32, i32, i32) {
    %c0_i32 = arith.constant 0 : i32
    %c0_i32_0 = arith.constant 0 : i32
    %c0_i32_1 = arith.constant 0 : i32
    return %arg0, %c0_i32, %c0_i32_0 : i32, i32, i32
  }
  func.func @transform_5(%arg0: i32) -> (i32, i32, i32) {
    %c0_i32 = arith.constant 0 : i32
    %c0_i32_0 = arith.constant 0 : i32
    %c0_i32_1 = arith.constant 0 : i32
    return %arg0, %c0_i32, %c0_i32_0 : i32, i32, i32
  }
  func.func @transform_6(%arg0: i32) -> (i32, i32, i32) {
    %c0_i32 = arith.constant 0 : i32
    %c0_i32_0 = arith.constant 0 : i32
    %c0_i32_1 = arith.constant 0 : i32
    return %arg0, %c0_i32, %c0_i32_0 : i32, i32, i32
  }
}

</mosaic_0001>

<bundles_post_ra>
// kernel: feature_extractor_block.1
= control target key start
LH: loop header
LB: loop body
LE: loop exit
PB: predicated region body
PF: predicated region fallthrough
CT: control target
= control target key end

     0   :  { %s687_s21 = smov 0   ;;  %s726_s0 = inlined_call_operand.vmem [shape: f32[2,4,16], index: 0, kind: input, shape index: {}]   ;;  %s727_s1 = inlined_call_operand.vmem [shape: f32[8,12], index: 1, kind: input, shape index: {}]   ;;  %s728_s2 = inlined_call_operand.vmem [shape: f32[8,1], index: 2, kind: input, shape index: {}]   ;;  %s729_s3 = inlined_call_operand.vmem [shape: f32[16,8], index: 3, kind: input, shape index: {}]   ;;  %s730_s4 = inlined_call_operand.vmem [shape: f32[2,8,8], index: 4, kind: output, shape index: {0}]   ;;  %s731_s5 = inlined_call_operand.vmem [shape: f32[2,8,1], index: 5, kind: output, shape index: {1}]   ;;  %s732_s6 = inlined_call_operand.vmem [shape: f32[2,8,1], index: 6, kind: output, shape index: {2}]  }
   0x1 LB: > { %s585_s22 = sadd.s32 4294967295, %s644_s21   ;;  %p589_p0 = scmp.ge.s32.totalorder %s644_s21, 1  ;;  %s644_s21 = sphi %s687_s21, %s17_s21  }
   0x2   : > { %p216_p1 = scmp.lt.s32.totalorder %s644_s21, 3 }
   0x4   : > { %p217_p2 = pnand %p589_p0, %p216_p1 }
   0x5   : > { %p252_p3 = scmp.lt.s32.totalorder (!%p217_p2), %s585_s22, 1  ;;  %s647_s27 = smov (!%p217_p2), 1  }
   0x6   : > { %220 = sbr.rel (%p217_p2) target bundleno = 762 (0x2fa), region = 36  ;;  %s650_s28 = smov (!%p217_p2), 126  }
   0x7   : > { %s651_s29 = smov (!%p217_p2), 127  }
   0xb   : > { %vm268_vm0 = vcmask 3072   ;;  %vm270_vm1 = vcmask 142472   ;;  %v646_v0 = vmov 0.0   ;;  %s734_s22 = smov (!%p252_p3, %s585_s22), 1  ;;  %vm277_vm2 = vcmask 134152   ;;  %v290_v6 = vld [vmem:[%s728_s2] sm:$0xff] }
   0xc   : > { %269 = vst.msk [vmem:[#allocation2] sm:$0xf] %vm268_vm0, %v646_v0  ;;  %606 = vmatprep.subr.mxu0 %v646_v0  ;;  %613 = vmatprep.subr.mxu1 %v646_v0  ;;  %s590_s23 = sshll.u32 %s734_s22, 2  ;;  %vm648_vm3 = vmmov 0   ;;  %v649_v3 = vmov 0   ;;  %vm287_vm4 = vcmask 1043456  }
   0xd   : > { %271 = vst.msk [vmem:[#allocation2] sm:$0xf] %vm270_vm1, %v646_v0  ;;  %s255_s26 = scalar_lea.vmem %s726_s0, %s590_s23  ;;  %610 = vmatprep.mubr.msk.f32.mxu0 %vm648_vm3, %v646_v0  ;;  %617 = vmatprep.mubr.msk.f32.mxu1 %vm648_vm3, %v646_v0  ;;  %v289_v9 = vld [vmem:[%s727_s1] sm:$0xff]  ;;  %vm296_vm5 = vcmask 97280   ;;  %v394_v11 = vld [vmem:[%s729_s3 + $0x8] sm:$0xff]  ;;  %vm380_vm7 = vcmask 130048  }
   0xe   : > { %v272_v1 = vld [vmem:[%s255_s26] sm:$0xf]  ;;  %634 = vset.pattern.permute.xlu1 %v649_v3  ;;  %635 = vset.pattern.permute.xlu0 %v649_v3  ;;  %s591_s14 = sshll.u32 %s734_s22, 3  ;;  %vm390_vm8 = vcmask 7168   ;;  %vm468_vm9 = vcmask 64512  }
   0xf   : > { %274 = vrot.lane.b32.xlu0 %v272_v1, %s647_s27  ;;  %614 = vmatpush3.msra.mxu1 %v394_v11  ;;  %v393_v12 = vld [vmem:[%s729_s3] sm:$0xff]  ;;  %s263_s17 = scalar_lea.vmem %s731_s5, %s591_s14  ;;  %s259_s20 = scalar_lea.vmem %s730_s4, %s591_s14 }
  0x10   : > { %615 = vmatprep.subr.mxu1 %v646_v0  ;;  %s267_s24 = scalar_lea.vmem %s732_s6, %s591_s14 }
  0x11   : > { %616 = vmatpush3.msra.mxu1 %v393_v12 }
  0x81   : > { %v275_v2 = vpop.permute.xlu0 %274 }
  0x82   : > { %278 = vst.msk [vmem:[#allocation2] sm:$0xf] %vm277_vm2, %v275_v2 }
  0x89   : > { %v279_v4 = vld [vmem:[#allocation2] sm:$0xf] }
  0x8a   : > { %285 = vrot.lane.b32.xlu0 %v279_v4, %s650_s28  ;;  %v281_v5 = vrot.slane %v279_v4, 4 }
  0x8c   : > { %282 = vrot.lane.b32.xlu1 %v281_v5, %s651_s29 }
  0x90   : > { %293 = vperm.xlu1 %634, %v290_v6  }
  0xfc   : > { %v286_v7 = vpop.permute.xlu0 %285 }
  0xfd   : > { %607 = vmatpush3.msk.msra.mxu0 %vm287_vm4, %v286_v7 }
  0xfe   : > { %v283_v8 = vpop.permute.xlu1 %282  ;;  %608 = vmatprep.subr.mxu0 %v646_v0 }
  0xff   : > { %v288_v10 = vsel %vm287_vm4, %v279_v4, %v283_v8 }
 0x100   : > { %609 = vmatpush3.msra.mxu0 %v288_v10 }
 0x101   : > { %611 = vmatmul.mubr.msk.f32.vlgmr.msra.gmra.mxu0 %vm296_vm5, %v289_v9 }
 0x10b   : > { %v294_v13 = vpop.permute.xlu1 %293 }
 0x1c1   : > { %v368_v14 = vpop.f32.mrf.mxu0 }
 0x1c2   : > { %v369_v15 = vadd.f32 %v368_v14, %v294_v13 }
 0x1c3   : > { %v612_v16 = vpop.f32.mrf.mxu0 }
 0x1c4   : > { %v373_v17 = vmin.f32 %v369_v15, 0.0  ;;  %vm372_vm6 = vcmp.gt.f32.partialorder %v369_v15, 0.0 }
 0x1c6   : > { %v374_v18 = vmul.f32 1.442695, %v373_v17 }
 0x1c8   : > { %636 = vpow2.f32 %v374_v18 }
 0x1d5   : > { %v637_v19 = vpop.eup %636 }
 0x1d6   : > { %v596_v20 = vadd.f32 -1.0, %v637_v19 }
 0x1d8   : > { %v377_v21 = vmul.f32 1.6732632, %v596_v20 }
 0x1da   : > { %v378_v22 = vsel %vm372_vm6, %v369_v15, %v377_v21 }
 0x1db   : > { %v379_v23 = vmul.f32 1.050701, %v378_v22 }
 0x1dd   : > { %618 = vmatmul.mubr.msk.f32.vlgmr.msra.gmra.mxu1 %vm380_vm7, %v379_v23  ;;  %v381_v24 = vsel %vm380_vm7, %v379_v23, 0.0 }
 0x1de   : > { %382 = vadd.xlane.f32.xlu0 %v381_v24 }
 0x267   : > { %v383_v25 = vpop.xlane.xlu0 %382 }
 0x268   : > { %v384_v26 = vmul.f32 0.0625, %v383_v25  ;;  %391 = vst.msk [vmem:[%s263_s17] sm:$0xff] %vm390_vm8, %v383_v25 }
 0x26a   : > { %v385_v27 = vsub.f32 %v379_v23, %v384_v26 }
 0x26c   : > { %v386_v28 = vmul.f32 %v385_v27, %v385_v27 }
 0x26e   : > { %v387_v29 = vsel %vm380_vm7, %v386_v28, 0.0 }
 0x26f   : > { %388 = vadd.xlane.f32.xlu1 %v387_v29 }
 0x29d   : > { %v464_v30 = vpop.f32.mrf.mxu1 }
 0x29e   : > { %469 = vst.msk [vmem:[%s259_s20] sm:$0xff] %vm468_vm9, %v464_v30 }
 0x29f   : > { %v619_v31 = vpop.f32.mrf.mxu1 }
 0x2f8   : > { %v389_v32 = vpop.xlane.xlu1 %388 }
 0x2f9   : > { %392 = vst.msk [vmem:[%s267_s24] sm:$0xff] %vm390_vm8, %v389_v32 }
 0x2fa PF: > { %s17_s21 = sadd.s32 1, %s644_s21  }
 0x2fb   : > { %p14_p4 = scmp.ge.s32.totalorder %s17_s21, 4  }
 0x2fd   :  { %16 = sbr.rel (!%p14_p4) target bundleno = 1 (0x1), region = 90 }

</bundles_post_ra>
